<compile_context>
chip_gen: v7x
topology: tpu7x:2x2x1
jax: 0.10.0
libtpu: 0.0.40
codegen_flags: <defaults>
</compile_context>

<pallas_src>
import functools

import jax
import jax.numpy as jnp
from jax.experimental import pallas as pl
from jax.experimental.pallas import tpu as pltpu

D_MODEL, D_K, D_V, N_HEADS, D_FF = 32, 8, 8, 4, 64
LN_EPS = 1e-5  # nn.LayerNorm default, gamma=1 / beta=0 (constructed fresh in forward)


def _layer_norm(x):
    mean = jnp.mean(x, axis=-1, keepdims=True)
    var = jnp.mean((x - mean) ** 2, axis=-1, keepdims=True)
    return (x - mean) * jax.lax.rsqrt(var + LN_EPS)


def encoder_layer_kernel(x_ref, wq_ref, wk_ref, wv_ref, wo_ref, w1_ref, w2_ref,
                         out_ref, attn_ref, *, n_heads, d_k, d_v):
    bb, S, D = x_ref.shape
    x = x_ref[...].astype(jnp.float32).reshape(bb * S, D)            # [bb*S, D]

    # --- Multi-head self attention ---------------------------------------
    # Projections over all token rows of the block at once (one MXU pass each).
    q = jnp.dot(x, wq_ref[...], preferred_element_type=jnp.float32)  # [bb*S, H*dk]
    k = jnp.dot(x, wk_ref[...], preferred_element_type=jnp.float32)  # [bb*S, H*dk]
    v = jnp.dot(x, wv_ref[...], preferred_element_type=jnp.float32)  # [bb*S, H*dv]

    q3 = q.reshape(bb, S, n_heads * d_k)
    k3 = k.reshape(bb, S, n_heads * d_k)
    v3 = v.reshape(bb, S, n_heads * d_v)

    scale = 1.0 / (d_k ** 0.5)
    attn_heads = []
    attn_out = jnp.zeros((bb * S, D), jnp.float32)
    for h in range(n_heads):                       # static unroll; batched over bb
        qh = q3[:, :, h * d_k:(h + 1) * d_k]       # [bb, S, dk]
        kh = k3[:, :, h * d_k:(h + 1) * d_k]
        vh = v3[:, :, h * d_v:(h + 1) * d_v]

        s = jnp.einsum('bqd,bkd->bqk', qh, kh,
                       preferred_element_type=jnp.float32) * scale   # [bb, S, S]
        s = s - jnp.max(s, axis=-1, keepdims=True)
        e = jnp.exp(s)
        denom = jnp.sum(e, axis=-1, keepdims=True)
        r = pl.reciprocal(denom, approx=True)      # EUP slot (≈ free)
        r = r * (2.0 - denom * r)                  # one Newton step -> full f32 acc.
        p = e * r                                  # softmax probabilities
        attn_heads.append(p)

        ctx_h = jnp.einsum('bqk,bkd->bqd', p, vh,
                           preferred_element_type=jnp.float32)       # [bb, S, dv]
        # Fold this head's output projection directly: equivalent to concat -> @ W_O.
        attn_out = attn_out + jnp.dot(
            ctx_h.reshape(bb * S, d_v),
            wo_ref[h * d_v:(h + 1) * d_v, :],
            preferred_element_type=jnp.float32)

    # Single store of all attention probabilities for this block.
    attn_ref[...] = jnp.stack(attn_heads, axis=1).astype(attn_ref.dtype)

    y1 = _layer_norm(attn_out + x)                                    # residual + LN

    # --- Position-wise feed-forward ---------------------------------------
    h1 = jnp.maximum(jnp.dot(y1, w1_ref[...], preferred_element_type=jnp.float32), 0.0)
    ffn = jnp.dot(h1, w2_ref[...], preferred_element_type=jnp.float32)
    y2 = _layer_norm(ffn + y1)                                        # residual + LN

    out_ref[...] = y2.reshape(bb, S, D).astype(out_ref.dtype)


def encoder_layer(x, wq, wk, wv, wo, w1, w2, *,
                  n_heads=N_HEADS, d_k=D_K, d_v=D_V, batch_blocks=1):
    """batch_blocks: number of grid steps (use 2 on v7x so both TCs get work)."""
    B, S, D = x.shape
    assert B % batch_blocks == 0
    bb = B // batch_blocks
    d_ff = w1.shape[1]

    kernel = functools.partial(encoder_layer_kernel,
                               n_heads=n_heads, d_k=d_k, d_v=d_v)

    def full_spec(a):
        zeros = (0,) * a.ndim
        return pl.BlockSpec(a.shape, lambda i, _z=zeros: _z)

    out_shape = (
        jax.ShapeDtypeStruct((B, S, D), jnp.float32),
        jax.ShapeDtypeStruct((B, n_heads, S, S), jnp.float32),
    )

    flops = int(
        3 * 2 * B * S * D * (n_heads * d_k)          # Q/K/V projections
        + 2 * B * n_heads * S * S * d_k              # scores
        + 2 * B * n_heads * S * S * d_v              # attn @ V
        + 2 * B * S * (n_heads * d_v) * D            # output projection
        + 2 * B * S * D * d_ff * 2                   # FFN
    )
    transcendentals = int(B * n_heads * S * S + 2 * B * S)
    bytes_accessed = int(sum(a.size * 4 for a in (x, wq, wk, wv, wo, w1, w2))
                         + B * S * D * 4 + B * n_heads * S * S * 4)

    return pl.pallas_call(
        kernel,
        out_shape=out_shape,
        grid_spec=pltpu.PrefetchScalarGridSpec(
            num_scalar_prefetch=0,
            grid=(batch_blocks,),
            in_specs=[
                pl.BlockSpec((bb, S, D), lambda i: (i, 0, 0)),
                full_spec(wq), full_spec(wk), full_spec(wv),
                full_spec(wo), full_spec(w1), full_spec(w2),
            ],
            out_specs=(
                pl.BlockSpec((bb, S, D), lambda i: (i, 0, 0)),
                pl.BlockSpec((bb, n_heads, S, S), lambda i: (i, 0, 0, 0)),
            ),
        ),
        compiler_params=pltpu.CompilerParams(dimension_semantics=("parallel",)),
        cost_estimate=pl.CostEstimate(flops=flops,
                                      transcendentals=transcendentals,
                                      bytes_accessed=bytes_accessed),
    )(x, wq, wk, wv, wo, w1, w2)


def _reference(x, wq, wk, wv, wo, w1, w2):
    B, S, D = x.shape
    q = (x @ wq).reshape(B, S, N_HEADS, D_K).transpose(0, 2, 1, 3)
    k = (x @ wk).reshape(B, S, N_HEADS, D_K).transpose(0, 2, 1, 3)
    v = (x @ wv).reshape(B, S, N_HEADS, D_V).transpose(0, 2, 1, 3)
    scores = jnp.einsum("bhqd,bhkd->bhqk", q, k) / (D_K ** 0.5)
    attn = jax.nn.softmax(scores, axis=-1)
    ctx = jnp.einsum("bhqk,bhkd->bhqd", attn, v).transpose(0, 2, 1, 3).reshape(B, S, -1)
    y1 = _layer_norm(ctx @ wo + x)
    ffn = jnp.maximum(y1 @ w1, 0.0) @ w2
    return _layer_norm(ffn + y1), attn


if __name__ == "__main__":
    B, S = 2, 8
    key = jax.random.PRNGKey(0)
    kx, kq, kk, kv, ko, k1, k2 = jax.random.split(key, 7)

    x = jax.random.normal(kx, (B, S, D_MODEL), dtype=jnp.float32)
    # nn.Linear(d_model, n_heads*d_k, bias=False) etc. — stored here as [in, out].
    wq = jax.random.normal(kq, (D_MODEL, N_HEADS * D_K), jnp.float32) * 0.1
    wk = jax.random.normal(kk, (D_MODEL, N_HEADS * D_K), jnp.float32) * 0.1
    wv = jax.random.normal(kv, (D_MODEL, N_HEADS * D_V), jnp.float32) * 0.1
    wo = jax.random.normal(ko, (N_HEADS * D_V, D_MODEL), jnp.float32) * 0.1
    w1 = jax.random.normal(k1, (D_MODEL, D_FF), jnp.float32) * 0.1
    w2 = jax.random.normal(k2, (D_FF, D_MODEL), jnp.float32) * 0.1

    enc_out, attn = encoder_layer(x, wq, wk, wv, wo, w1, w2)
    jax.block_until_ready((enc_out, attn))

    ref_out, ref_attn = _reference(x, wq, wk, wv, wo, w1, w2)
    assert jnp.allclose(enc_out, ref_out, atol=2e-4, rtol=2e-4)
    assert jnp.allclose(attn, ref_attn, atol=2e-4, rtol=2e-4)

    print("KERNEL_OK")
</pallas_src>

<mosaic_0001>
module attributes {stable_mosaic.version = 11 : i64} {
  func.func @encoder_layer_kernel(%arg0: i32, %arg1: memref<2x8x32xf32, #tpu.memory_space<vmem>>, %arg2: memref<32x32xf32, #tpu.memory_space<vmem>>, %arg3: memref<32x32xf32, #tpu.memory_space<vmem>>, %arg4: memref<32x32xf32, #tpu.memory_space<vmem>>, %arg5: memref<32x32xf32, #tpu.memory_space<vmem>>, %arg6: memref<32x64xf32, #tpu.memory_space<vmem>>, %arg7: memref<64x32xf32, #tpu.memory_space<vmem>>, %arg8: memref<2x8x32xf32, #tpu.memory_space<vmem>>, %arg9: memref<2x4x8x8xf32, #tpu.memory_space<vmem>>) attributes {dimension_semantics = [#tpu.dimension_semantics<parallel>], iteration_bounds = array<i64: 1>, scalar_prefetch = 0 : i64, scratch_operands = 0 : i64, tpu.core_type = #tpu.core_type<tc>, window_params = [{transform_indices = @transform_0, window_bounds = array<i64: 2, 8, 32>}, {pipeline_mode = #tpu.pipeline_mode<synchronous>, transform_indices = @transform_1, window_bounds = array<i64: 32, 32>}, {pipeline_mode = #tpu.pipeline_mode<synchronous>, transform_indices = @transform_2, window_bounds = array<i64: 32, 32>}, {pipeline_mode = #tpu.pipeline_mode<synchronous>, transform_indices = @transform_3, window_bounds = array<i64: 32, 32>}, {pipeline_mode = #tpu.pipeline_mode<synchronous>, transform_indices = @transform_4, window_bounds = array<i64: 32, 32>}, {pipeline_mode = #tpu.pipeline_mode<synchronous>, transform_indices = @transform_5, window_bounds = array<i64: 32, 64>}, {pipeline_mode = #tpu.pipeline_mode<synchronous>, transform_indices = @transform_6, window_bounds = array<i64: 64, 32>}, {transform_indices = @transform_7, window_bounds = array<i64: 2, 8, 32>}, {transform_indices = @transform_8, window_bounds = array<i64: 2, 4, 8, 8>}]} {
    %c0 = arith.constant 0 : index
    %c0_0 = arith.constant 0 : index
    %c0_1 = arith.constant 0 : index
    %0 = vector.load %arg1[%c0, %c0_0, %c0_1] : memref<2x8x32xf32, #tpu.memory_space<vmem>>, vector<2x8x32xf32>
    %1 = vector.shape_cast %0 : vector<2x8x32xf32> to vector<16x32xf32>
    %c0_2 = arith.constant 0 : index
    %c0_3 = arith.constant 0 : index
    %2 = vector.load %arg2[%c0_2, %c0_3] : memref<32x32xf32, #tpu.memory_space<vmem>>, vector<32x32xf32>
    %cst = arith.constant dense<0.000000e+00> : vector<16x32xf32>
    %3 = tpu.matmul %1, %2, %cst {dimension_numbers = #tpu.dot_dimension_numbers<[1], [0], [0], [1], [0, 0, 1, 1], [], []>} : vector<16x32xf32>, vector<32x32xf32>, vector<16x32xf32> -> vector<16x32xf32>
    %c0_4 = arith.constant 0 : index
    %c0_5 = arith.constant 0 : index
    %4 = vector.load %arg3[%c0_4, %c0_5] : memref<32x32xf32, #tpu.memory_space<vmem>>, vector<32x32xf32>
    %cst_6 = arith.constant dense<0.000000e+00> : vector<16x32xf32>
    %5 = tpu.matmul %1, %4, %cst_6 {dimension_numbers = #tpu.dot_dimension_numbers<[1], [0], [0], [1], [0, 0, 1, 1], [], []>} : vector<16x32xf32>, vector<32x32xf32>, vector<16x32xf32> -> vector<16x32xf32>
    %c0_7 = arith.constant 0 : index
    %c0_8 = arith.constant 0 : index
    %6 = vector.load %arg4[%c0_7, %c0_8] : memref<32x32xf32, #tpu.memory_space<vmem>>, vector<32x32xf32>
    %cst_9 = arith.constant dense<0.000000e+00> : vector<16x32xf32>
    %7 = tpu.matmul %1, %6, %cst_9 {dimension_numbers = #tpu.dot_dimension_numbers<[1], [0], [0], [1], [0, 0, 1, 1], [], []>} : vector<16x32xf32>, vector<32x32xf32>, vector<16x32xf32> -> vector<16x32xf32>
    %8 = vector.shape_cast %3 : vector<16x32xf32> to vector<2x8x32xf32>
    %9 = vector.shape_cast %5 : vector<16x32xf32> to vector<2x8x32xf32>
    %10 = vector.shape_cast %7 : vector<16x32xf32> to vector<2x8x32xf32>
    %cst_10 = arith.constant 0.000000e+00 : f32
    %11 = vector.broadcast %cst_10 : f32 to vector<16x32xf32>
    %12 = vector.extract_strided_slice %8 {offsets = [0, 0, 0], sizes = [2, 8, 8], strides = [1, 1, 1]} : vector<2x8x32xf32> to vector<2x8x8xf32>
    %13 = vector.extract_strided_slice %9 {offsets = [0, 0, 0], sizes = [2, 8, 8], strides = [1, 1, 1]} : vector<2x8x32xf32> to vector<2x8x8xf32>
    %14 = vector.extract_strided_slice %10 {offsets = [0, 0, 0], sizes = [2, 8, 8], strides = [1, 1, 1]} : vector<2x8x32xf32> to vector<2x8x8xf32>
    "tpu.trace_start"() <{level = 10 : i32, message = "bqd,bkd->bqk"}> : () -> ()
    %cst_11 = arith.constant dense<0.000000e+00> : vector<2x8x8xf32>
    %15 = tpu.matmul %12, %13, %cst_11 {dimension_numbers = #tpu.dot_dimension_numbers<[2], [2], [1], [1], [0, 0, 0, 1, 1, 1], [0], [0]>} : vector<2x8x8xf32>, vector<2x8x8xf32>, vector<2x8x8xf32> -> vector<2x8x8xf32>
    "tpu.trace_stop"() : () -> ()
    %cst_12 = arith.constant 0.353553385 : f32
    %16 = vector.broadcast %cst_12 : f32 to vector<2x8x8xf32>
    %17 = arith.mulf %15, %16 : vector<2x8x8xf32>
    %cst_13 = arith.constant dense<0xFF800000> : vector<2x8xf32>
    %18 = vector.multi_reduction <maximumf>, %17, %cst_13 [2] : vector<2x8x8xf32> to vector<2x8xf32>
    %19 = vector.shape_cast %18 : vector<2x8xf32> to vector<2x8x1xf32>
    %20 = vector.broadcast %19 : vector<2x8x1xf32> to vector<2x8x8xf32>
    %21 = arith.subf %17, %20 : vector<2x8x8xf32>
    %22 = math.exp %21 : vector<2x8x8xf32>
    %cst_14 = arith.constant dense<0.000000e+00> : vector<2x8xf32>
    %23 = vector.multi_reduction <add>, %22, %cst_14 [2] : vector<2x8x8xf32> to vector<2x8xf32>
    %24 = vector.shape_cast %23 : vector<2x8xf32> to vector<2x8x1xf32>
    %25 = tpu.reciprocal %24 {approx = true} : vector<2x8x1xf32> -> vector<2x8x1xf32>
    %26 = arith.mulf %24, %25 : vector<2x8x1xf32>
    %cst_15 = arith.constant 2.000000e+00 : f32
    %27 = vector.broadcast %cst_15 : f32 to vector<2x8x1xf32>
    %28 = arith.subf %27, %26 : vector<2x8x1xf32>
    %29 = arith.mulf %25, %28 : vector<2x8x1xf32>
    %30 = vector.broadcast %29 : vector<2x8x1xf32> to vector<2x8x8xf32>
    %31 = arith.mulf %22, %30 : vector<2x8x8xf32>
    "tpu.trace_start"() <{level = 10 : i32, message = "bqk,bkd->bqd"}> : () -> ()
    %cst_16 = arith.constant dense<0.000000e+00> : vector<2x8x8xf32>
    %32 = tpu.matmul %31, %14, %cst_16 {dimension_numbers = #tpu.dot_dimension_numbers<[2], [1], [1], [2], [0, 0, 0, 1, 1, 2], [0], [0]>} : vector<2x8x8xf32>, vector<2x8x8xf32>, vector<2x8x8xf32> -> vector<2x8x8xf32>
    "tpu.trace_stop"() : () -> ()
    %33 = vector.shape_cast %32 : vector<2x8x8xf32> to vector<16x8xf32>
    %c0_17 = arith.constant 0 : index
    %c0_18 = arith.constant 0 : index
    %34 = vector.load %arg5[%c0_17, %c0_18] : memref<32x32xf32, #tpu.memory_space<vmem>>, vector<8x32xf32>
    %cst_19 = arith.constant dense<0.000000e+00> : vector<16x32xf32>
    %35 = tpu.matmul %33, %34, %cst_19 {dimension_numbers = #tpu.dot_dimension_numbers<[1], [0], [0], [1], [0, 0, 1, 1], [], []>} : vector<16x8xf32>, vector<8x32xf32>, vector<16x32xf32> -> vector<16x32xf32>
    %36 = arith.addf %11, %35 : vector<16x32xf32>
    %37 = vector.extract_strided_slice %8 {offsets = [0, 0, 8], sizes = [2, 8, 8], strides = [1, 1, 1]} : vector<2x8x32xf32> to vector<2x8x8xf32>
    %38 = vector.extract_strided_slice %9 {offsets = [0, 0, 8], sizes = [2, 8, 8], strides = [1, 1, 1]} : vector<2x8x32xf32> to vector<2x8x8xf32>
    %39 = vector.extract_strided_slice %10 {offsets = [0, 0, 8], sizes = [2, 8, 8], strides = [1, 1, 1]} : vector<2x8x32xf32> to vector<2x8x8xf32>
    "tpu.trace_start"() <{level = 10 : i32, message = "bqd,bkd->bqk"}> : () -> ()
    %cst_20 = arith.constant dense<0.000000e+00> : vector<2x8x8xf32>
    %40 = tpu.matmul %37, %38, %cst_20 {dimension_numbers = #tpu.dot_dimension_numbers<[2], [2], [1], [1], [0, 0, 0, 1, 1, 1], [0], [0]>} : vector<2x8x8xf32>, vector<2x8x8xf32>, vector<2x8x8xf32> -> vector<2x8x8xf32>
    "tpu.trace_stop"() : () -> ()
    %cst_21 = arith.constant 0.353553385 : f32
    %41 = vector.broadcast %cst_21 : f32 to vector<2x8x8xf32>
    %42 = arith.mulf %40, %41 : vector<2x8x8xf32>
    %cst_22 = arith.constant dense<0xFF800000> : vector<2x8xf32>
    %43 = vector.multi_reduction <maximumf>, %42, %cst_22 [2] : vector<2x8x8xf32> to vector<2x8xf32>
    %44 = vector.shape_cast %43 : vector<2x8xf32> to vector<2x8x1xf32>
    %45 = vector.broadcast %44 : vector<2x8x1xf32> to vector<2x8x8xf32>
    %46 = arith.subf %42, %45 : vector<2x8x8xf32>
    %47 = math.exp %46 : vector<2x8x8xf32>
    %cst_23 = arith.constant dense<0.000000e+00> : vector<2x8xf32>
    %48 = vector.multi_reduction <add>, %47, %cst_23 [2] : vector<2x8x8xf32> to vector<2x8xf32>
    %49 = vector.shape_cast %48 : vector<2x8xf32> to vector<2x8x1xf32>
    %50 = tpu.reciprocal %49 {approx = true} : vector<2x8x1xf32> -> vector<2x8x1xf32>
    %51 = arith.mulf %49, %50 : vector<2x8x1xf32>
    %cst_24 = arith.constant 2.000000e+00 : f32
    %52 = vector.broadcast %cst_24 : f32 to vector<2x8x1xf32>
    %53 = arith.subf %52, %51 : vector<2x8x1xf32>
    %54 = arith.mulf %50, %53 : vector<2x8x1xf32>
    %55 = vector.broadcast %54 : vector<2x8x1xf32> to vector<2x8x8xf32>
    %56 = arith.mulf %47, %55 : vector<2x8x8xf32>
    "tpu.trace_start"() <{level = 10 : i32, message = "bqk,bkd->bqd"}> : () -> ()
    %cst_25 = arith.constant dense<0.000000e+00> : vector<2x8x8xf32>
    %57 = tpu.matmul %56, %39, %cst_25 {dimension_numbers = #tpu.dot_dimension_numbers<[2], [1], [1], [2], [0, 0, 0, 1, 1, 2], [0], [0]>} : vector<2x8x8xf32>, vector<2x8x8xf32>, vector<2x8x8xf32> -> vector<2x8x8xf32>
    "tpu.trace_stop"() : () -> ()
    %58 = vector.shape_cast %57 : vector<2x8x8xf32> to vector<16x8xf32>
    %c8 = arith.constant 8 : index
    %c0_26 = arith.constant 0 : index
    %59 = vector.load %arg5[%c8, %c0_26] : memref<32x32xf32, #tpu.memory_space<vmem>>, vector<8x32xf32>
    %cst_27 = arith.constant dense<0.000000e+00> : vector<16x32xf32>
    %60 = tpu.matmul %58, %59, %cst_27 {dimension_numbers = #tpu.dot_dimension_numbers<[1], [0], [0], [1], [0, 0, 1, 1], [], []>} : vector<16x8xf32>, vector<8x32xf32>, vector<16x32xf32> -> vector<16x32xf32>
    %61 = arith.addf %36, %60 : vector<16x32xf32>
    %62 = vector.extract_strided_slice %8 {offsets = [0, 0, 16], sizes = [2, 8, 8], strides = [1, 1, 1]} : vector<2x8x32xf32> to vector<2x8x8xf32>
    %63 = vector.extract_strided_slice %9 {offsets = [0, 0, 16], sizes = [2, 8, 8], strides = [1, 1, 1]} : vector<2x8x32xf32> to vector<2x8x8xf32>
    %64 = vector.extract_strided_slice %10 {offsets = [0, 0, 16], sizes = [2, 8, 8], strides = [1, 1, 1]} : vector<2x8x32xf32> to vector<2x8x8xf32>
    "tpu.trace_start"() <{level = 10 : i32, message = "bqd,bkd->bqk"}> : () -> ()
    %cst_28 = arith.constant dense<0.000000e+00> : vector<2x8x8xf32>
    %65 = tpu.matmul %62, %63, %cst_28 {dimension_numbers = #tpu.dot_dimension_numbers<[2], [2], [1], [1], [0, 0, 0, 1, 1, 1], [0], [0]>} : vector<2x8x8xf32>, vector<2x8x8xf32>, vector<2x8x8xf32> -> vector<2x8x8xf32>
    "tpu.trace_stop"() : () -> ()
    %cst_29 = arith.constant 0.353553385 : f32
    %66 = vector.broadcast %cst_29 : f32 to vector<2x8x8xf32>
    %67 = arith.mulf %65, %66 : vector<2x8x8xf32>
    %cst_30 = arith.constant dense<0xFF800000> : vector<2x8xf32>
    %68 = vector.multi_reduction <maximumf>, %67, %cst_30 [2] : vector<2x8x8xf32> to vector<2x8xf32>
    %69 = vector.shape_cast %68 : vector<2x8xf32> to vector<2x8x1xf32>
    %70 = vector.broadcast %69 : vector<2x8x1xf32> to vector<2x8x8xf32>
    %71 = arith.subf %67, %70 : vector<2x8x8xf32>
    %72 = math.exp %71 : vector<2x8x8xf32>
    %cst_31 = arith.constant dense<0.000000e+00> : vector<2x8xf32>
    %73 = vector.multi_reduction <add>, %72, %cst_31 [2] : vector<2x8x8xf32> to vector<2x8xf32>
    %74 = vector.shape_cast %73 : vector<2x8xf32> to vector<2x8x1xf32>
    %75 = tpu.reciprocal %74 {approx = true} : vector<2x8x1xf32> -> vector<2x8x1xf32>
    %76 = arith.mulf %74, %75 : vector<2x8x1xf32>
    %cst_32 = arith.constant 2.000000e+00 : f32
    %77 = vector.broadcast %cst_32 : f32 to vector<2x8x1xf32>
    %78 = arith.subf %77, %76 : vector<2x8x1xf32>
    %79 = arith.mulf %75, %78 : vector<2x8x1xf32>
    %80 = vector.broadcast %79 : vector<2x8x1xf32> to vector<2x8x8xf32>
    %81 = arith.mulf %72, %80 : vector<2x8x8xf32>
    "tpu.trace_start"() <{level = 10 : i32, message = "bqk,bkd->bqd"}> : () -> ()
    %cst_33 = arith.constant dense<0.000000e+00> : vector<2x8x8xf32>
    %82 = tpu.matmul %81, %64, %cst_33 {dimension_numbers = #tpu.dot_dimension_numbers<[2], [1], [1], [2], [0, 0, 0, 1, 1, 2], [0], [0]>} : vector<2x8x8xf32>, vector<2x8x8xf32>, vector<2x8x8xf32> -> vector<2x8x8xf32>
    "tpu.trace_stop"() : () -> ()
    %83 = vector.shape_cast %82 : vector<2x8x8xf32> to vector<16x8xf32>
    %c16 = arith.constant 16 : index
    %c0_34 = arith.constant 0 : index
    %84 = vector.load %arg5[%c16, %c0_34] : memref<32x32xf32, #tpu.memory_space<vmem>>, vector<8x32xf32>
    %cst_35 = arith.constant dense<0.000000e+00> : vector<16x32xf32>
    %85 = tpu.matmul %83, %84, %cst_35 {dimension_numbers = #tpu.dot_dimension_numbers<[1], [0], [0], [1], [0, 0, 1, 1], [], []>} : vector<16x8xf32>, vector<8x32xf32>, vector<16x32xf32> -> vector<16x32xf32>
    %86 = arith.addf %61, %85 : vector<16x32xf32>
    %87 = vector.extract_strided_slice %8 {offsets = [0, 0, 24], sizes = [2, 8, 8], strides = [1, 1, 1]} : vector<2x8x32xf32> to vector<2x8x8xf32>
    %88 = vector.extract_strided_slice %9 {offsets = [0, 0, 24], sizes = [2, 8, 8], strides = [1, 1, 1]} : vector<2x8x32xf32> to vector<2x8x8xf32>
    %89 = vector.extract_strided_slice %10 {offsets = [0, 0, 24], sizes = [2, 8, 8], strides = [1, 1, 1]} : vector<2x8x32xf32> to vector<2x8x8xf32>
    "tpu.trace_start"() <{level = 10 : i32, message = "bqd,bkd->bqk"}> : () -> ()
    %cst_36 = arith.constant dense<0.000000e+00> : vector<2x8x8xf32>
    %90 = tpu.matmul %87, %88, %cst_36 {dimension_numbers = #tpu.dot_dimension_numbers<[2], [2], [1], [1], [0, 0, 0, 1, 1, 1], [0], [0]>} : vector<2x8x8xf32>, vector<2x8x8xf32>, vector<2x8x8xf32> -> vector<2x8x8xf32>
    "tpu.trace_stop"() : () -> ()
    %cst_37 = arith.constant 0.353553385 : f32
    %91 = vector.broadcast %cst_37 : f32 to vector<2x8x8xf32>
    %92 = arith.mulf %90, %91 : vector<2x8x8xf32>
    %cst_38 = arith.constant dense<0xFF800000> : vector<2x8xf32>
    %93 = vector.multi_reduction <maximumf>, %92, %cst_38 [2] : vector<2x8x8xf32> to vector<2x8xf32>
    %94 = vector.shape_cast %93 : vector<2x8xf32> to vector<2x8x1xf32>
    %95 = vector.broadcast %94 : vector<2x8x1xf32> to vector<2x8x8xf32>
    %96 = arith.subf %92, %95 : vector<2x8x8xf32>
    %97 = math.exp %96 : vector<2x8x8xf32>
    %cst_39 = arith.constant dense<0.000000e+00> : vector<2x8xf32>
    %98 = vector.multi_reduction <add>, %97, %cst_39 [2] : vector<2x8x8xf32> to vector<2x8xf32>
    %99 = vector.shape_cast %98 : vector<2x8xf32> to vector<2x8x1xf32>
    %100 = tpu.reciprocal %99 {approx = true} : vector<2x8x1xf32> -> vector<2x8x1xf32>
    %101 = arith.mulf %99, %100 : vector<2x8x1xf32>
    %cst_40 = arith.constant 2.000000e+00 : f32
    %102 = vector.broadcast %cst_40 : f32 to vector<2x8x1xf32>
    %103 = arith.subf %102, %101 : vector<2x8x1xf32>
    %104 = arith.mulf %100, %103 : vector<2x8x1xf32>
    %105 = vector.broadcast %104 : vector<2x8x1xf32> to vector<2x8x8xf32>
    %106 = arith.mulf %97, %105 : vector<2x8x8xf32>
    "tpu.trace_start"() <{level = 10 : i32, message = "bqk,bkd->bqd"}> : () -> ()
    %cst_41 = arith.constant dense<0.000000e+00> : vector<2x8x8xf32>
    %107 = tpu.matmul %106, %89, %cst_41 {dimension_numbers = #tpu.dot_dimension_numbers<[2], [1], [1], [2], [0, 0, 0, 1, 1, 2], [0], [0]>} : vector<2x8x8xf32>, vector<2x8x8xf32>, vector<2x8x8xf32> -> vector<2x8x8xf32>
    "tpu.trace_stop"() : () -> ()
    %108 = vector.shape_cast %107 : vector<2x8x8xf32> to vector<16x8xf32>
    %c24 = arith.constant 24 : index
    %c0_42 = arith.constant 0 : index
    %109 = vector.load %arg5[%c24, %c0_42] : memref<32x32xf32, #tpu.memory_space<vmem>>, vector<8x32xf32>
    %cst_43 = arith.constant dense<0.000000e+00> : vector<16x32xf32>
    %110 = tpu.matmul %108, %109, %cst_43 {dimension_numbers = #tpu.dot_dimension_numbers<[1], [0], [0], [1], [0, 0, 1, 1], [], []>} : vector<16x8xf32>, vector<8x32xf32>, vector<16x32xf32> -> vector<16x32xf32>
    %111 = arith.addf %86, %110 : vector<16x32xf32>
    %112 = vector.shape_cast %31 : vector<2x8x8xf32> to vector<2x1x8x8xf32>
    %113 = vector.shape_cast %56 : vector<2x8x8xf32> to vector<2x1x8x8xf32>
    %114 = vector.shape_cast %81 : vector<2x8x8xf32> to vector<2x1x8x8xf32>
    %115 = vector.shape_cast %106 : vector<2x8x8xf32> to vector<2x1x8x8xf32>
    %116 = tpu.concatenate %112, %113, %114, %115 in 1 : vector<2x1x8x8xf32>, vector<2x1x8x8xf32>, vector<2x1x8x8xf32>, vector<2x1x8x8xf32> -> vector<2x4x8x8xf32>
    %c0_44 = arith.constant 0 : index
    %c0_45 = arith.constant 0 : index
    %c0_46 = arith.constant 0 : index
    %c0_47 = arith.constant 0 : index
    %117 = vector.load %arg9[%c0_44, %c0_45, %c0_46, %c0_47] : memref<2x4x8x8xf32, #tpu.memory_space<vmem>>, vector<2x4x8x8xf32>
    tpu.vector_store %arg9[%c0_44, %c0_45, %c0_46, %c0_47], %116 {strides = array<i32>} : memref<2x4x8x8xf32, #tpu.memory_space<vmem>>, vector<2x4x8x8xf32>,
    %118 = arith.addf %111, %1 : vector<16x32xf32>
    %cst_48 = arith.constant dense<0.000000e+00> : vector<16xf32>
    %119 = vector.multi_reduction <add>, %118, %cst_48 [1] : vector<16x32xf32> to vector<16xf32>
    %120 = vector.shape_cast %119 : vector<16xf32> to vector<16x1xf32>
    %cst_49 = arith.constant 3.200000e+01 : f32
    %121 = vector.broadcast %cst_49 : f32 to vector<16x1xf32>
    %122 = arith.divf %120, %121 : vector<16x1xf32>
    %123 = vector.broadcast %122 : vector<16x1xf32> to vector<16x32xf32>
    %124 = arith.subf %118, %123 : vector<16x32xf32>
    %125 = arith.mulf %124, %124 : vector<16x32xf32>
    %cst_50 = arith.constant dense<0.000000e+00> : vector<16xf32>
    %126 = vector.multi_reduction <add>, %125, %cst_50 [1] : vector<16x32xf32> to vector<16xf32>
    %127 = vector.shape_cast %126 : vector<16xf32> to vector<16x1xf32>
    %cst_51 = arith.constant 3.200000e+01 : f32
    %128 = vector.broadcast %cst_51 : f32 to vector<16x1xf32>
    %129 = arith.divf %127, %128 : vector<16x1xf32>
    %130 = vector.broadcast %122 : vector<16x1xf32> to vector<16x32xf32>
    %131 = arith.subf %118, %130 : vector<16x32xf32>
    %cst_52 = arith.constant 9.99999974E-6 : f32
    %132 = vector.broadcast %cst_52 : f32 to vector<16x1xf32>
    %133 = arith.addf %129, %132 : vector<16x1xf32>
    %134 = math.rsqrt %133 : vector<16x1xf32>
    %135 = vector.broadcast %134 : vector<16x1xf32> to vector<16x32xf32>
    %136 = arith.mulf %131, %135 : vector<16x32xf32>
    %c0_53 = arith.constant 0 : index
    %c0_54 = arith.constant 0 : index
    %137 = vector.load %arg6[%c0_53, %c0_54] : memref<32x64xf32, #tpu.memory_space<vmem>>, vector<32x64xf32>
    %cst_55 = arith.constant dense<0.000000e+00> : vector<16x64xf32>
    %138 = tpu.matmul %136, %137, %cst_55 {dimension_numbers = #tpu.dot_dimension_numbers<[1], [0], [0], [1], [0, 0, 1, 1], [], []>} : vector<16x32xf32>, vector<32x64xf32>, vector<16x64xf32> -> vector<16x64xf32>
    %cst_56 = arith.constant 0.000000e+00 : f32
    %139 = vector.broadcast %cst_56 : f32 to vector<16x64xf32>
    %140 = arith.maximumf %138, %139 : vector<16x64xf32>
    %c0_57 = arith.constant 0 : index
    %c0_58 = arith.constant 0 : index
    %141 = vector.load %arg7[%c0_57, %c0_58] : memref<64x32xf32, #tpu.memory_space<vmem>>, vector<64x32xf32>
    %cst_59 = arith.constant dense<0.000000e+00> : vector<16x32xf32>
    %142 = tpu.matmul %140, %141, %cst_59 {dimension_numbers = #tpu.dot_dimension_numbers<[1], [0], [0], [1], [0, 0, 1, 1], [], []>} : vector<16x64xf32>, vector<64x32xf32>, vector<16x32xf32> -> vector<16x32xf32>
    %143 = arith.addf %142, %136 : vector<16x32xf32>
    %cst_60 = arith.constant dense<0.000000e+00> : vector<16xf32>
    %144 = vector.multi_reduction <add>, %143, %cst_60 [1] : vector<16x32xf32> to vector<16xf32>
    %145 = vector.shape_cast %144 : vector<16xf32> to vector<16x1xf32>
    %cst_61 = arith.constant 3.200000e+01 : f32
    %146 = vector.broadcast %cst_61 : f32 to vector<16x1xf32>
    %147 = arith.divf %145, %146 : vector<16x1xf32>
    %148 = vector.broadcast %147 : vector<16x1xf32> to vector<16x32xf32>
    %149 = arith.subf %143, %148 : vector<16x32xf32>
    %150 = arith.mulf %149, %149 : vector<16x32xf32>
    %cst_62 = arith.constant dense<0.000000e+00> : vector<16xf32>
    %151 = vector.multi_reduction <add>, %150, %cst_62 [1] : vector<16x32xf32> to vector<16xf32>
    %152 = vector.shape_cast %151 : vector<16xf32> to vector<16x1xf32>
    %cst_63 = arith.constant 3.200000e+01 : f32
    %153 = vector.broadcast %cst_63 : f32 to vector<16x1xf32>
    %154 = arith.divf %152, %153 : vector<16x1xf32>
    %155 = vector.broadcast %147 : vector<16x1xf32> to vector<16x32xf32>
    %156 = arith.subf %143, %155 : vector<16x32xf32>
    %cst_64 = arith.constant 9.99999974E-6 : f32
    %157 = vector.broadcast %cst_64 : f32 to vector<16x1xf32>
    %158 = arith.addf %154, %157 : vector<16x1xf32>
    %159 = math.rsqrt %158 : vector<16x1xf32>
    %160 = vector.broadcast %159 : vector<16x1xf32> to vector<16x32xf32>
    %161 = arith.mulf %156, %160 : vector<16x32xf32>
    %162 = vector.shape_cast %161 : vector<16x32xf32> to vector<2x8x32xf32>
    %c0_65 = arith.constant 0 : index
    %c0_66 = arith.constant 0 : index
    %c0_67 = arith.constant 0 : index
    %163 = vector.load %arg8[%c0_65, %c0_66, %c0_67] : memref<2x8x32xf32, #tpu.memory_space<vmem>>, vector<2x8x32xf32>
    tpu.vector_store %arg8[%c0_65, %c0_66, %c0_67], %162 {strides = array<i32>} : memref<2x8x32xf32, #tpu.memory_space<vmem>>, vector<2x8x32xf32>,
    return
  }
  func.func @transform_0(%arg0: i32) -> (i32, i32, i32) {
    %c0_i32 = arith.constant 0 : i32
    %c0_i32_0 = arith.constant 0 : i32
    %c0_i32_1 = arith.constant 0 : i32
    return %arg0, %c0_i32, %c0_i32_0 : i32, i32, i32
  }
  func.func @transform_1(%arg0: i32) -> (i32, i32) {
    %c0_i32 = arith.constant 0 : i32
    %c0_i32_0 = arith.constant 0 : i32
    %c0_i32_1 = arith.constant 0 : i32
    return %c0_i32, %c0_i32_0 : i32, i32
  }
  func.func @transform_2(%arg0: i32) -> (i32, i32) {
    %c0_i32 = arith.constant 0 : i32
    %c0_i32_0 = arith.constant 0 : i32
    %c0_i32_1 = arith.constant 0 : i32
    return %c0_i32, %c0_i32_0 : i32, i32
  }
  func.func @transform_3(%arg0: i32) -> (i32, i32) {
    %c0_i32 = arith.constant 0 : i32
    %c0_i32_0 = arith.constant 0 : i32
    %c0_i32_1 = arith.constant 0 : i32
    return %c0_i32, %c0_i32_0 : i32, i32
  }
  func.func @transform_4(%arg0: i32) -> (i32, i32) {
    %c0_i32 = arith.constant 0 : i32
    %c0_i32_0 = arith.constant 0 : i32
    %c0_i32_1 = arith.constant 0 : i32
    return %c0_i32, %c0_i32_0 : i32, i32
  }
  func.func @transform_5(%arg0: i32) -> (i32, i32) {
    %c0_i32 = arith.constant 0 : i32
    %c0_i32_0 = arith.constant 0 : i32
    %c0_i32_1 = arith.constant 0 : i32
    return %c0_i32, %c0_i32_0 : i32, i32
  }
  func.func @transform_6(%arg0: i32) -> (i32, i32) {
    %c0_i32 = arith.constant 0 : i32
    %c0_i32_0 = arith.constant 0 : i32
    %c0_i32_1 = arith.constant 0 : i32
    return %c0_i32, %c0_i32_0 : i32, i32
  }
  func.func @transform_7(%arg0: i32) -> (i32, i32, i32) {
    %c0_i32 = arith.constant 0 : i32
    %c0_i32_0 = arith.constant 0 : i32
    %c0_i32_1 = arith.constant 0 : i32
    return %arg0, %c0_i32, %c0_i32_0 : i32, i32, i32
  }
  func.func @transform_8(%arg0: i32) -> (i32, i32, i32, i32) {
    %c0_i32 = arith.constant 0 : i32
    %c0_i32_0 = arith.constant 0 : i32
    %c0_i32_1 = arith.constant 0 : i32
    %c0_i32_2 = arith.constant 0 : i32
    return %arg0, %c0_i32, %c0_i32_0, %c0_i32_1 : i32, i32, i32, i32
  }
}

</mosaic_0001>

<bundles_post_ra>
// kernel: tpu_custom_call.1
= control target key start
LH: loop header
LB: loop body
LE: loop exit
PB: predicated region body
PF: predicated region fallthrough
CT: control target
= control target key end

     0   :  { %14 = vsyncpa [#allocation3], 0  ;;  %s3170_s0 = inlined_call_operand.hbm [shape: f32[2,8,32], index: 0, kind: input, shape index: {}]   ;;  %s3171_s1 = inlined_call_operand.vmem [shape: f32[32,32], index: 1, kind: input, shape index: {}]   ;;  %s3172_s2 = inlined_call_operand.vmem [shape: f32[32,32], index: 2, kind: input, shape index: {}]   ;;  %s3173_s3 = inlined_call_operand.vmem [shape: f32[32,32], index: 3, kind: input, shape index: {}]   ;;  %s3174_s4 = inlined_call_operand.hbm [shape: f32[32,32], index: 4, kind: input, shape index: {}]   ;;  %s3175_s5 = inlined_call_operand.hbm [shape: f32[32,64], index: 5, kind: input, shape index: {}]   ;;  %s3176_s6 = inlined_call_operand.vmem [shape: f32[64,32], index: 6, kind: input, shape index: {}]   ;;  %s3177_s7 = inlined_call_operand.hbm [shape: f32[2,8,32], index: 7, kind: output, shape index: {0}]   ;;  %s3178_s8 = inlined_call_operand.hbm [shape: f32[2,4,8,8], index: 8, kind: output, shape index: {1}]  }
   0x1   :  { %15 = vsyncpa [#allocation6], 0 }
   0x2   :  { %16 = vsyncpa [#allocation4], 0 }
   0x3   :  { %17 = vsyncpa [#allocation10], 0  ;;  %s2777_s27 = smov [#allocation5]   ;;  %s2778_s29 = smov [#allocation2]  }
   0x4   :  { %s41_s28 = sshll.u32 %s2777_s27, 4  ;;  %s23_s30 = sshll.u32 %s2778_s29, 4  ;;  %s42_s28 = int_to_ptr.vmem [resolvable:$true] %s41_s28  ;;  %s2834_s30 = int_to_ptr.vmem [resolvable:$true] %s23_s30 }
   0x5   :  { %s2659_s11 = scalar_lea.hbm %s3174_s4, 512 }
   0x6   :  { %p2660_p0 = scmp.ne.s32.totalorder %s3174_s4, %s2659_s11  ;;  %p2663_p1 = scmp.lt.u32.totalorder %s2659_s11, %s3174_s4 }
   0x8   :  { %p2665_p2 = pnand %p2663_p1, %p2660_p0 }
   0xa   :  { %2668 = shalt.err (!%p2665_p2)
}
   0xb   :  { %s2669_s16 = scalar_lea.vmem %s42_s28, 512  ;;  %p2674_p4 = scmp.lt.s32.totalorder %s42_s28, %s42_s28 }
   0xc   :  { %p2670_p3 = scmp.ne.s32.totalorder %s42_s28, %s2669_s16  ;;  %p2675_p5 = scmp.lt.s32.totalorder %s2669_s16, %s2669_s16 }
   0xe   :  { %p2676_p6 = por %p2675_p5, %p2674_p4 }
  0x10   :  { %p2677_p7 = pnand %p2676_p6, %p2670_p3 }
  0x12   :  { %2680 = shalt.err (!%p2677_p7)
}
  0x13   :  { %s2779_s17 = smov 128   ;;  %s2780_s18 = smov 8  }
  0x14   :  { %47 = dma.hbm_to_vmem [thread:$0]  %s3174_s4, 512, %s42_s28, [#allocation6], %s2779_s17, %s2779_s17, %s2780_s18  }
  0x15   :  { %s2681_s23 = scalar_lea.hbm %s3170_s0, 256 }
  0x16   :  { %p2682_p8 = scmp.ne.s32.totalorder %s3170_s0, %s2681_s23  ;;  %p2685_p9 = scmp.lt.u32.totalorder %s2681_s23, %s3170_s0 }
  0x18   :  { %p2687_p10 = pnand %p2685_p9, %p2682_p8 }
  0x1a   :  { %2690 = shalt.err (!%p2687_p10)
}
  0x1b   :  { %s2691_s29 = scalar_lea.vmem %s2834_s30, 256  ;;  %p2696_p12 = scmp.lt.s32.totalorder %s2834_s30, %s2834_s30 }
  0x1c   :  { %p2692_p11 = scmp.ne.s32.totalorder %s2834_s30, %s2691_s29  ;;  %p2697_p13 = scmp.lt.s32.totalorder %s2691_s29, %s2691_s29 }
  0x1e   :  { %p2698_p0 = por %p2697_p13, %p2696_p12 }
  0x20   :  { %p2699_p1 = pnand %p2698_p0, %p2692_p11 }
  0x22   :  { %2702 = shalt.err (!%p2699_p1)
}
  0x23   :  { %29 = dma.hbm_to_vmem [thread:$0]  %s3170_s0, 256, %s2834_s30, [#allocation3], %s2779_s17, %s2779_s17, %s2780_s18  }
  0x24   :  { %s2781_s9 = smov [#allocation7]   ;;  %s2703_s13 = scalar_lea.hbm %s3175_s5, 512 }
  0x25   :  { %s53_s10 = sshll.u32 %s2781_s9, 4  ;;  %p2704_p2 = scmp.ne.s32.totalorder %s3175_s5, %s2703_s13  ;;  %s54_s10 = int_to_ptr.vmem [resolvable:$true] %s53_s10 }
  0x26   :  { %p2707_p3 = scmp.lt.u32.totalorder %s2703_s13, %s3175_s5 }
  0x28   :  { %p2709_p4 = pnand %p2707_p3, %p2704_p2 }
  0x2a   :  { %2712 = shalt.err (!%p2709_p4)
}
  0x2b   :  { %s2713_s20 = scalar_lea.vmem %s54_s10, 512  ;;  %p2718_p6 = scmp.lt.s32.totalorder %s54_s10, %s54_s10 }
  0x2c   :  { %p2714_p5 = scmp.ne.s32.totalorder %s54_s10, %s2713_s20  ;;  %p2719_p7 = scmp.lt.s32.totalorder %s2713_s20, %s2713_s20 }
  0x2e   :  { %p2720_p8 = por %p2719_p7, %p2718_p6 }
  0x30   :  { %p2721_p9 = pnand %p2720_p8, %p2714_p5 }
  0x32   :  { %2724 = shalt.err (!%p2721_p9)
}
  0x33   :  { %59 = dma.hbm_to_vmem [thread:$0]  %s3175_s5, 512, %s54_s10, [#allocation6], %s2779_s17, %s2779_s17, %s2780_s18  }
  0x34   :  { %2769 = dma.done.wait [#allocation3], 256  }
  0x35   :  { %2770 = vsyncadd [#allocation3], 4294967040 }
  0x36   :  { %2771 = dma.done.wait [#allocation6], 1024  }
  0x37   :  { %2772 = vsyncadd [#allocation6], 4294966272  ;;  %vm77_vm0 = vcmask 261120   ;;  %v73_v0 = vld [vmem:[%s3171_s1] sm:$0xff]  ;;  %v74_v1 = vld [vmem:[%s3171_s1 + $0x8] sm:$0xff]  ;;  %v2782_v14 = vmov 0.0  }
  0x38   :  { %v75_v2 = vld [vmem:[%s3171_s1 + $0x10] sm:$0xff]  ;;  %v2553_v3 = vpack.c.bf16 %v74_v1, %v73_v0  ;;  %v76_v4 = vld [vmem:[%s3171_s1 + $0x18] sm:$0xff]  ;;  %v2898_v5 = vld [vmem:[#allocation2] sm:$0xff]  ;;  %vm2783_vm1 = vmmov 0   ;;  %vm317_vm2 = vcmask 64512   ;;  %s2786_s21 = smov 104  }
  0x39   :  { %v2557_v6 = vpack.c.bf16 %v76_v4, %v75_v2  ;;  %2398 = vmatprep.mubr.msk.f32.mxu1 %vm77_vm0, %v2898_v5  ;;  %v159_v7 = vld [vmem:[%s3172_s2] sm:$0xff]  ;;  %v160_v8 = vld [vmem:[%s3172_s2 + $0x8] sm:$0xff]  ;;  %2420 = vmatprep.mubr.msk.f32.mxu0 %vm77_vm0, %v2898_v5  ;;  %v161_v10 = vld [vmem:[%s3172_s2 + $0x10] sm:$0xff]  ;;  %vm2126_vm3 = vcmask 523264  }
  0x3a   :  { %2554 = vmatprep.subr.bf16.mxu1 %v2553_v3  ;;  %v2561_v9 = vpack.c.bf16 %v160_v8, %v159_v7  ;;  %v162_v11 = vld [vmem:[%s3172_s2 + $0x18] sm:$0xff]  ;;  %v2916_v12 = vld [vmem:[#allocation2 + $0x8] sm:$0xff]  ;;  %s2784_s2 = smov 120   ;;  %v238_v19 = vld [vmem:[%s3173_s3] sm:$0xff] }
  0x3b   :  { %2556 = vmatpush3.bf16.msra.mxu1 %v2553_v3  ;;  %v2565_v13 = vpack.c.bf16 %v162_v11, %v161_v10  ;;  %v239_v20 = vld [vmem:[%s3173_s3 + $0x8] sm:$0xff]  ;;  %v240_v21 = vld [vmem:[%s3173_s3 + $0x10] sm:$0xff]  ;;  %v241_v23 = vld [vmem:[%s3173_s3 + $0x18] sm:$0xff]  ;;  %s2785_s3 = smov 112  }
  0x3c   :  { %2558 = vmatprep.subr.bf16.mxu1 %v2557_v6  ;;  %v2569_v22 = vpack.c.bf16 %v239_v20, %v238_v19  ;;  %v2573_v24 = vpack.c.bf16 %v241_v23, %v240_v21 }
  0x3e   :  { %2570 = vmatprep.subr.bf16.mxu0 %v2569_v22 }
  0x3f   :  { %2560 = vmatpush3.bf16.msra.mxu1 %v2557_v6  ;;  %2572 = vmatpush3.bf16.msra.mxu0 %v2569_v22 }
  0x40   :  { %2562 = vmatprep.subr.bf16.mxu1 %v2561_v9  ;;  %2574 = vmatprep.subr.bf16.mxu0 %v2573_v24 }
  0x42   :  { %2399 = vmatmul.mubr.msk.f32.vlgmr.msra.gmra.mrb[0].mxu1 %vm77_vm0, %v2916_v12 }
  0x43   :  { %2564 = vmatpush3.bf16.msra.mxu1 %v2561_v9  ;;  %2409 = vmatprep.mubr.msk.f32.mxu1 %vm77_vm0, %v2898_v5 }
  0x44   :  { %2566 = vmatprep.subr.bf16.mxu1 %v2565_v13  ;;  %2576 = vmatpush3.bf16.msra.mxu0 %v2573_v24 }
  0x45   :  { %2433 = vmatprep.subr.mxu0 %v2782_v14 }
  0x47   :  { %2568 = vmatpush3.bf16.msra.mxu1 %v2565_v13  ;;  %2421 = vmatmul.mubr.msk.f32.vlgmr.msra.gmra.mrb[0].mxu0 %vm77_vm0, %v2916_v12 }
  0x48   :  { %2423 = vmatprep.subr.mxu1 %v2782_v14  ;;  %2435 = vmatprep.mubr.msk.f32.mxu0 %vm2783_vm1, %v2782_v14 }
  0x4a   :  { %2410 = vmatmul.mubr.msk.f32.vlgmr.msra.gmra.mrb[2].mxu1 %vm77_vm0, %v2916_v12 }
  0x4b   :  { %2425 = vmatprep.mubr.msk.f32.mxu1 %vm2783_vm1, %v2782_v14 }
 0x115   :  { %v2927_v15 = vpop.f32.mrb[0].mxu1 }
 0x116   :  { %v2929_v16 = vpop.f32.mrb[1].mxu1 }
 0x11a   :  { %v2973_v38 = vpop.f32.mrb[0].mxu0 }
 0x11b   :  { %v2977_v39 = vpop.f32.mrb[1].mxu0 }
 0x11c   :  { %2434 = vmatpush3.msra.mxu0 %v2977_v39 }
 0x11d   :  { %v2931_v17 = vpop.f32.mrb[2].mxu1  ;;  %2443 = vmatprep.subr.mxu0 %v2782_v14 }
 0x11e   :  { %727 = vrot.lane.b32.xlu1 %v2931_v17, %s2784_s2  ;;  %v2935_v18 = vpop.f32.mrb[3].mxu1 }
 0x11f   :  { %2424 = vmatpush3.xpose.msk.msra.mxu1 %vm317_vm2, %v2935_v18 }
 0x120   :  { %2428 = vmatprep.subr.mxu1 %v2782_v14 }
 0x122   :  { %725 = vrot.lane.b32.xlu1 %v2927_v15, %s2784_s2  ;;  %2426 = vmatmul.mubr.msk.f32.vlgmr.msra.gmra.mrb[4].mxu1 %vm317_vm2, %v2929_v16 }
 0x123   :  { %2429 = vmatpush3.xpose.msk.msra.mxu1 %vm317_vm2, %v2931_v17  ;;  %2430 = vmatprep.mubr.msk.f32.mxu1 %vm2783_vm1, %v2782_v14 }
 0x124   :  { %2438 = vmatprep.subr.mxu1 %v2782_v14 }
 0x126   :  { %2431 = vmatmul.mubr.msk.f32.vlgmr.msra.gmra.mrb[6].mxu1 %vm317_vm2, %v2927_v15 }
 0x127   :  { %2440 = vmatprep.mubr.msk.f32.mxu1 %vm2783_vm1, %v2782_v14  ;;  %2439 = vmatpush3.msra.mxu1 %v2973_v38 }
 0x128   :  { %2448 = vmatprep.subr.mxu1 %v2782_v14 }
 0x190   :  { %v728_v48 = vpop.permute.xlu1 %727 }
 0x194   :  { %v726_v52 = vpop.permute.xlu1 %725 }
 0x1f5   :  { %v390_v25 = vpop.f32.mrb[4].mxu1 }
 0x1f6   :  { %v2427_v26 = vpop.f32.mrb[5].mxu1  ;;  %v470_v35 = vmul.f32 0.35355338, %v390_v25 }
 0x1f8   :  { %v472_v37 = vsel %vm317_vm2, %v470_v35, -inf }
 0x1f9   :  { %v466_v27 = vpop.f32.mrb[6].mxu1 }
 0x1fa   :  { %v471_v28 = vmul.f32 0.35355338, %v466_v27  ;;  %v2432_v29 = vpop.f32.mrb[7].mxu1 }
 0x1fc   :  { %v475_v30 = vsel %vm317_vm2, %v471_v28, -inf }
 0x1fd   :  { %476 = vmax.xlane.f32.xlu0 %v475_v30 }
 0x28a   :  { %v477_v31 = vpop.xlane.xlu0 %476 }
 0x28b   :  { %v479_v32 = vsub.f32 %v471_v28, %v477_v31 }
 0x28d   :  { %v482_v33 = vmul.f32 1.442695, %v479_v32 }
 0x28f   :  { %2619 = vpow2.f32 %v482_v33 }
 0x299   :  { %v2620_v34 = vpop.eup %2619 }
 0x29a   :  { %v487_v36 = vsel %vm317_vm2, %v2620_v34, 0.0 }
 0x29b   :  { %488 = vadd.xlane.f32.xlu0 %v487_v36 }
 0x29f   :  { %473 = vmax.xlane.f32.xlu0 %v472_v37 }
 0x2b5   :  { %649 = vrot.lane.b32.xlu0 %v2935_v18, %s2784_s2 }
 0x2b9   :  { %647 = vrot.lane.b32.xlu0 %v2929_v16, %s2784_s2 }
 0x328   :  { %v489_v40 = vpop.xlane.xlu0 %488 }
 0x329   :  { %2621 = vrcp.f32 %v489_v40 }
 0x32c   :  { %v474_v41 = vpop.xlane.xlu0 %473 }
 0x32d   :  { %v478_v42 = vsub.f32 %v470_v35, %v474_v41 }
 0x32f   :  { %v480_v43 = vmul.f32 1.442695, %v478_v42 }
 0x330   :  { %v650_v59 = vpop.permute.xlu0 %649 }
 0x331   :  { %2623 = vpow2.f32 %v480_v43 }
 0x333   :  { %v2622_v44 = vpop.eup %2621 }
 0x334   :  { %v493_v45 = vmul.f32 %v2622_v44, %v489_v40  ;;  %v648_v61 = vpop.permute.xlu0 %647 }
 0x336   :  { %v495_v46 = vsub.f32 2.0, %v493_v45 }
 0x338   :  { %v497_v47 = vmul.f32 %v2622_v44, %v495_v46 }
 0x33a   :  { %v499_v49 = vmul.f32 %v2620_v34, %v497_v47 }
 0x33b   :  { %v2624_v50 = vpop.eup %2623 }
 0x33c   :  { %1998 = vst.msk [vmem:[#allocation9 + $0x20] sm:$0xff] %vm317_vm2, %v499_v49  ;;  %2441 = vmatmul.mubr.msk.f32.vlgmr.msra.gmra.mrb[8].mxu1 %vm317_vm2, %v499_v49  ;;  %v484_v51 = vsel %vm317_vm2, %v2624_v50, 0.0 }
 0x33d   :  { %2449 = vmatpush3.xpose.msk.msra.mxu1 %vm317_vm2, %v728_v48  ;;  %485 = vadd.xlane.f32.xlu1 %v484_v51 }
 0x33e   :  { %2450 = vmatprep.mubr.msk.f32.mxu1 %vm2783_vm1, %v2782_v14  ;;  %2458 = vmatprep.subr.mxu1 %v2782_v14 }
 0x340   :  { %2451 = vmatmul.mubr.msk.f32.vlgmr.msra.gmra.mrb[10].mxu1 %vm317_vm2, %v726_v52 }
 0x341   :  { %2460 = vmatprep.mubr.msk.f32.mxu1 %vm2783_vm1, %v2782_v14 }
 0x34e   :  { %911 = vrot.lane.b32.xlu1 %v2973_v38, %s2784_s2 }
 0x3ca   :  { %v486_v53 = vpop.xlane.xlu1 %485 }
 0x3cb   :  { %2625 = vrcp.f32 %v486_v53 }
 0x3ce   :  { %v912_v54 = vpop.permute.xlu1 %911 }
 0x3cf   :  { %2459 = vmatpush3.msra.mxu1 %v912_v54 }
 0x3d0   :  { %2473 = vmatprep.subr.mxu1 %v2782_v14 }
 0x3d5   :  { %v2626_v55 = vpop.eup %2625 }
 0x3d6   :  { %v492_v56 = vmul.f32 %v2626_v55, %v486_v53 }
 0x3d8   :  { %v494_v57 = vsub.f32 2.0, %v492_v56  ;;  %v987_v56 = vld [vmem:[#allocation5 + $0x8] sm:$0xff] }
 0x3da   :  { %v496_v58 = vmul.f32 %v2626_v55, %v494_v57  ;;  %v646_v57 = vld [vmem:[#allocation5] sm:$0xff] }
 0x3dc   :  { %v498_v60 = vmul.f32 %v2624_v50, %v496_v58 }
 0x3de   :  { %1994 = vst.msk [vmem:[#allocation9] sm:$0xff] %vm317_vm2, %v498_v60  ;;  %2436 = vmatmul.mubr.msk.f32.vlgmr.msra.gmra.mrb[2].mxu0 %vm317_vm2, %v498_v60 }
 0x3df   :  { %2444 = vmatpush3.xpose.msk.msra.mxu0 %vm317_vm2, %v650_v59  ;;  %2445 = vmatprep.mubr.msk.f32.mxu0 %vm2783_vm1, %v2782_v14 }
 0x3e0   :  { %2453 = vmatprep.subr.mxu0 %v2782_v14 }
 0x3e2   :  { %2446 = vmatmul.mubr.msk.f32.vlgmr.msra.gmra.mrb[4].mxu0 %vm317_vm2, %v648_v61 }
 0x3e3   :  { %2455 = vmatprep.mubr.msk.f32.mxu0 %vm2783_vm1, %v2782_v14 }
 0x40f   :  { %v3007_v62 = vpop.f32.mrb[8].mxu1 }
 0x410   :  { %v2442_v63 = vpop.f32.mrb[9].mxu1 }
 0x413   :  { %v799_v0 = vpop.f32.mrb[10].mxu1 }
 0x414   :  { %v804_v1 = vmul.f32 0.35355338, %v799_v0  ;;  %v2452_v2 = vpop.f32.mrb[11].mxu1 }
 0x416   :  { %v808_v3 = vsel %vm317_vm2, %v804_v1, -inf }
 0x417   :  { %809 = vmax.xlane.f32.xlu0 %v808_v3 }
 0x42d   :  { %1150 = vrot.lane.b32.xlu0 %v2929_v16, %s2785_s3 }
 0x4a4   :  { %v810_v4 = vpop.xlane.xlu0 %809 }
 0x4a5   :  { %v812_v6 = vsub.f32 %v804_v1, %v810_v4 }
 0x4a7   :  { %v815_v7 = vmul.f32 1.442695, %v812_v6 }
 0x4a8   :  { %v1151_v30 = vpop.permute.xlu0 %1150 }
 0x4a9   :  { %2627 = vpow2.f32 %v815_v7 }
 0x4b1   :  { %v3012_v8 = vpop.f32.mrb[2].mxu0 }
 0x4b2   :  { %v2437_v9 = vpop.f32.mrb[3].mxu0 }
 0x4b3   :  { %v2628_v10 = vpop.eup %2627 }
 0x4b4   :  { %v820_v11 = vsel %vm317_vm2, %v2628_v10, 0.0 }
 0x4b5   :  { %v721_v13 = vpop.f32.mrb[4].mxu0  ;;  %821 = vadd.xlane.f32.xlu1 %v820_v11 }
 0x4b6   :  { %v2447_v19 = vpop.f32.mrb[5].mxu0  ;;  %v803_v20 = vmul.f32 0.35355338, %v721_v13 }
 0x4b8   :  { %v805_v21 = vsel %vm317_vm2, %v803_v20, -inf }
 0x4c6   :  { %1152 = vrot.lane.b32.xlu1 %v2935_v18, %s2785_s3 }
 0x4ca   :  { %1230 = vrot.lane.b32.xlu1 %v2931_v17, %s2785_s3 }
 0x4ce   :  { %1228 = vrot.lane.b32.xlu1 %v2927_v15, %s2785_s3 }
 0x4f2   :  { %806 = vmax.xlane.f32.xlu1 %v805_v21 }
 0x503   :  { %834 = vrot.lane.b32.xlu1 %v2977_v39, %s2784_s2 }
 0x542   :  { %v822_v22 = vpop.xlane.xlu1 %821 }
 0x543   :  { %2629 = vrcp.f32 %v822_v22 }
 0x546   :  { %v1153_v26 = vpop.permute.xlu1 %1152 }
 0x54a   :  { %v1231_v29 = vpop.permute.xlu1 %1230 }
 0x54d   :  { %v2630_v23 = vpop.eup %2629 }
 0x54e   :  { %v826_v24 = vmul.f32 %v2630_v23, %v822_v22  ;;  %v1229_v31 = vpop.permute.xlu1 %1228 }
 0x550   :  { %v828_v25 = vsub.f32 2.0, %v826_v24 }
 0x552   :  { %v830_v27 = vmul.f32 %v2630_v23, %v828_v25 }
 0x554   :  { %v832_v28 = vmul.f32 %v2628_v10, %v830_v27 }
 0x556   :  { %1999 = vst.msk [vmem:[#allocation9 + $0x28] sm:$0xff] %vm317_vm2, %v832_v28  ;;  %2461 = vmatmul.mubr.msk.f32.vlgmr.msra.gmra.mrb[12].mxu1 %vm317_vm2, %v832_v28 }
 0x557   :  { %2474 = vmatpush3.xpose.msk.msra.mxu1 %vm317_vm2, %v1153_v26  ;;  %2475 = vmatprep.mubr.msk.f32.mxu1 %vm2783_vm1, %v2782_v14 }
 0x558   :  { %2478 = vmatprep.subr.mxu1 %v2782_v14 }
 0x55a   :  { %2476 = vmatmul.mubr.msk.f32.vlgmr.msra.gmra.mrb[14].mxu1 %vm317_vm2, %v1151_v30 }
 0x55b   :  { %2479 = vmatpush3.xpose.msk.msra.mxu1 %vm317_vm2, %v1231_v29  ;;  %2480 = vmatprep.mubr.msk.f32.mxu1 %vm2783_vm1, %v2782_v14 }
 0x55c   :  { %2488 = vmatprep.subr.mxu1 %v2782_v14 }
 0x55e   :  { %2481 = vmatmul.mubr.msk.f32.vlgmr.msra.gmra.mrb[16].mxu1 %vm317_vm2, %v1229_v31 }
 0x55f   :  { %2490 = vmatprep.mubr.msk.f32.mxu1 %vm2783_vm1, %v2782_v14 }
 0x57f   :  { %v807_v32 = vpop.xlane.xlu1 %806 }
 0x580   :  { %v811_v33 = vsub.f32 %v803_v20, %v807_v32 }
 0x582   :  { %v813_v34 = vmul.f32 1.442695, %v811_v33 }
 0x583   :  { %v835_v35 = vpop.permute.xlu1 %834 }
 0x584   :  { %2631 = vpow2.f32 %v813_v34  ;;  %2454 = vmatpush3.msra.mxu0 %v835_v35 }
 0x585   :  { %2463 = vmatprep.subr.mxu0 %v987_v56 }
 0x58e   :  { %v2632_v36 = vpop.eup %2631 }
 0x58f   :  { %v817_v37 = vsel %vm317_vm2, %v2632_v36, 0.0 }
 0x590   :  { %818 = vadd.xlane.f32.xlu0 %v817_v37 }
 0x61d   :  { %v819_v40 = vpop.xlane.xlu0 %818 }
 0x61e   :  { %2633 = vrcp.f32 %v819_v40 }
 0x628   :  { %v2634_v41 = vpop.eup %2633 }
 0x629   :  { %v825_v42 = vmul.f32 %v2634_v41, %v819_v40  ;;  %v983_v43 = vpop.f32.mrb[12].mxu1 }
 0x62a   :  { %v2462_v44 = vpop.f32.mrb[13].mxu1 }
 0x62b   :  { %v827_v45 = vsub.f32 2.0, %v825_v42 }
 0x62d   :  { %v829_v46 = vmul.f32 %v2634_v41, %v827_v45  ;;  %v1224_v47 = vpop.f32.mrb[14].mxu1 }
 0x62e   :  { %v1306_v48 = vmul.f32 0.35355338, %v1224_v47  ;;  %v2477_v49 = vpop.f32.mrb[15].mxu1 }
 0x62f   :  { %v831_v50 = vmul.f32 %v2632_v36, %v829_v46 }
 0x630   :  { %v1308_v51 = vsel %vm317_vm2, %v1306_v48, -inf }
 0x631   :  { %1995 = vst.msk [vmem:[#allocation9 + $0x8] sm:$0xff] %vm317_vm2, %v831_v50  ;;  %2456 = vmatmul.mubr.msk.f32.vlgmr.msra.gmra.mrb[6].mxu0 %vm317_vm2, %v831_v50  ;;  %1309 = vmax.xlane.f32.xlu0 %v1308_v51  ;;  %v1302_v52 = vpop.f32.mrb[16].mxu1 }
 0x632   :  { %v1307_v53 = vmul.f32 0.35355338, %v1302_v52  ;;  %v2482_v54 = vpop.f32.mrb[17].mxu1  ;;  %2464 = vmatpush3.msra.mxu0 %v987_v56 }
 0x633   :  { %2468 = vmatprep.subr.mxu0 %v646_v57 }
 0x634   :  { %v1311_v55 = vsel %vm317_vm2, %v1307_v53, -inf }
 0x635   :  { %1312 = vmax.xlane.f32.xlu0 %v1311_v55 }
 0x6be   :  { %v1310_v58 = vpop.xlane.xlu0 %1309 }
 0x6bf   :  { %v1314_v59 = vsub.f32 %v1306_v48, %v1310_v58 }
 0x6c1   :  { %v1316_v60 = vmul.f32 1.442695, %v1314_v59 }
 0x6c2   :  { %v1313_v61 = vpop.xlane.xlu0 %1312 }
 0x6c3   :  { %2635 = vpow2.f32 %v1316_v60  ;;  %v1315_v63 = vsub.f32 %v1307_v53, %v1313_v61 }
 0x6c5   :  { %v1318_v0 = vmul.f32 1.442695, %v1315_v63 }
 0x6c7   :  { %2637 = vpow2.f32 %v1318_v0 }
 0x6cd   :  { %v2636_v1 = vpop.eup %2635 }
 0x6ce   :  { %v1320_v2 = vsel %vm317_vm2, %v2636_v1, 0.0 }
 0x6cf   :  { %1321 = vadd.xlane.f32.xlu0 %v1320_v2 }
 0x6d1   :  { %v2638_v3 = vpop.eup %2637 }
 0x6d2   :  { %v1323_v4 = vsel %vm317_vm2, %v2638_v3, 0.0 }
 0x6d3   :  { %1324 = vadd.xlane.f32.xlu1 %v1323_v4 }
 0x6e4   :  { %1572 = vrot.lane.b32.xlu1 %v2929_v16, %s2786_s21 }
 0x6e5   :  { %1336 = vrot.lane.b32.xlu0 %v2977_v39, %s2785_s3 }
 0x6e9   :  { %1412 = vrot.lane.b32.xlu0 %v2973_v38, %s2785_s3 }
 0x6ed   :  { %1574 = vrot.lane.b32.xlu0 %v2935_v18, %s2786_s21 }
 0x6f1   :  { %1652 = vrot.lane.b32.xlu0 %v2931_v17, %s2786_s21 }
 0x6f5   :  { %1650 = vrot.lane.b32.xlu0 %v2927_v15, %s2786_s21  ;;  %v1488_v15 = vld [vmem:[#allocation5 + $0x10] sm:$0xff] }
 0x704   :  { %v906_v6 = vpop.f32.mrb[6].mxu0 }
 0x705   :  { %v2457_v7 = vpop.f32.mrb[7].mxu0  ;;  %2465 = vmatprep.mubr.msk.f32.mxu0 %vm317_vm2, %v906_v6 }
 0x706   :  { %2466 = vmatmul.mubr.msk.f32.vlgmr.msra.gmra.mrb[8].mxu0 %vm317_vm2, %v983_v43 }
 0x707   :  { %2470 = vmatprep.mubr.msk.f32.mxu0 %vm317_vm2, %v3012_v8  ;;  %2469 = vmatpush3.msra.mxu0 %v646_v57 }
 0x708   :  { %2483 = vmatprep.subr.mxu0 %v2782_v14 }
 0x70e   :  { %2471 = vmatmul.mubr.msk.f32.vlgmr.msra.gmra.mrb[8].mxu0 %vm317_vm2, %v3007_v62 }
 0x70f   :  { %2485 = vmatprep.mubr.msk.f32.mxu0 %vm2783_vm1, %v2782_v14 }
 0x75c   :  { %v1322_v16 = vpop.xlane.xlu0 %1321 }
 0x75d   :  { %2639 = vrcp.f32 %v1322_v16 }
 0x760   :  { %v1325_v17 = vpop.xlane.xlu1 %1324  ;;  %v1337_v18 = vpop.permute.xlu0 %1336 }
 0x761   :  { %2641 = vrcp.f32 %v1325_v17  ;;  %2484 = vmatpush3.msra.mxu0 %v1337_v18 }
 0x762   :  { %2493 = vmatprep.subr.mxu0 %v1488_v15 }
 0x764   :  { %v1413_v9 = vpop.permute.xlu0 %1412  ;;  %v1573_v25 = vpop.permute.xlu1 %1572 }
 0x765   :  { %2489 = vmatpush3.msra.mxu1 %v1413_v9 }
 0x766   :  { %2498 = vmatprep.subr.mxu1 %v2782_v14 }
 0x767   :  { %v2640_v8 = vpop.eup %2639 }
 0x768   :  { %v1328_v10 = vmul.f32 %v2640_v8, %v1322_v16  ;;  %v1575_v24 = vpop.permute.xlu0 %1574 }
 0x76a   :  { %v1330_v11 = vsub.f32 2.0, %v1328_v10 }
 0x76b   :  { %v2642_v13 = vpop.eup %2641 }
 0x76c   :  { %v1332_v62 = vmul.f32 %v2640_v8, %v1330_v11  ;;  %v1329_v19 = vmul.f32 %v2642_v13, %v1325_v17  ;;  %v1653_v28 = vpop.permute.xlu0 %1652 }
 0x76e   :  { %v1334_v20 = vmul.f32 %v2636_v1, %v1332_v62  ;;  %v1331_v21 = vsub.f32 2.0, %v1329_v19  ;;  %v1910_v1 = vld [vmem:[#allocation5 + $0x18] sm:$0xff] }
 0x770   :  { %1996 = vst.msk [vmem:[#allocation9 + $0x10] sm:$0xff] %vm317_vm2, %v1334_v20  ;;  %v1333_v22 = vmul.f32 %v2642_v13, %v1331_v21  ;;  %2486 = vmatmul.mubr.msk.f32.vlgmr.msra.gmra.mrb[10].mxu0 %vm317_vm2, %v1334_v20  ;;  %v1651_v31 = vpop.permute.xlu0 %1650 }
 0x771   :  { %2494 = vmatpush3.msra.mxu0 %v1488_v15 }
 0x772   :  { %v1335_v23 = vmul.f32 %v2638_v3, %v1333_v22  ;;  %2503 = vmatprep.subr.mxu0 %v2782_v14  ;;  %v2032_v22 = vld [vmem:[#allocation7 + $0x8] sm:$0xff] }
 0x774   :  { %2000 = vst.msk [vmem:[#allocation9 + $0x30] sm:$0xff] %vm317_vm2, %v1335_v23  ;;  %2491 = vmatmul.mubr.msk.f32.vlgmr.msra.gmra.mrb[18].mxu1 %vm317_vm2, %v1335_v23  ;;  %v2033_v23 = vld [vmem:[#allocation7 + $0x10] sm:$0xff] }
 0x775   :  { %2499 = vmatpush3.xpose.msk.msra.mxu1 %vm317_vm2, %v1575_v24  ;;  %2500 = vmatprep.mubr.msk.f32.mxu1 %vm2783_vm1, %v2782_v14 }
 0x776   :  { %2508 = vmatprep.subr.mxu1 %v2782_v14 }
 0x778   :  { %2501 = vmatmul.mubr.msk.f32.vlgmr.msra.gmra.mrb[20].mxu1 %vm317_vm2, %v1573_v25  ;;  %v2034_v25 = vld [vmem:[#allocation7 + $0x18] sm:$0xff] }
 0x779   :  { %2510 = vmatprep.mubr.msk.f32.mxu1 %vm2783_vm1, %v2782_v14 }
 0x843   :  { %v1408_v26 = vpop.f32.mrb[10].mxu0 }
 0x844   :  { %v2487_v27 = vpop.f32.mrb[11].mxu0  ;;  %2495 = vmatprep.mubr.msk.f32.mxu0 %vm317_vm2, %v1408_v26  ;;  %v2581_v26 = vpack.c.bf16 %v2034_v25, %v2033_v23 }
 0x845   :  { %v2118_v27 = vld [vmem:[%s3176_s6] sm:$0xff] }
 0x847   :  { %v1484_v29 = vpop.f32.mrb[18].mxu1 }
 0x848   :  { %v2492_v30 = vpop.f32.mrb[19].mxu1  ;;  %2496 = vmatmul.mubr.msk.f32.vlgmr.msra.gmra.mrb[8].mxu0 %vm317_vm2, %v1484_v29  ;;  %v2120_v29 = vld [vmem:[%s3176_s6 + $0x10] sm:$0xff] }
 0x849   :  { %2504 = vmatpush3.xpose.msk.msra.mxu0 %vm317_vm2, %v1653_v28  ;;  %2505 = vmatprep.mubr.msk.f32.mxu0 %vm2783_vm1, %v2782_v14  ;;  %v2119_v28 = vld [vmem:[%s3176_s6 + $0x8] sm:$0xff] }
 0x84a   :  { %2513 = vmatprep.subr.mxu0 %v2782_v14  ;;  %v2585_v30 = vpack.c.bf16 %v2119_v28, %v2118_v27 }
 0x84b   :  { %v1646_v32 = vpop.f32.mrb[20].mxu1 }
 0x84c   :  { %v1728_v33 = vmul.f32 0.35355338, %v1646_v32  ;;  %v2502_v34 = vpop.f32.mrb[21].mxu1  ;;  %2506 = vmatmul.mubr.msk.f32.vlgmr.msra.gmra.mrb[12].mxu0 %vm317_vm2, %v1651_v31  ;;  %v2121_v31 = vld [vmem:[%s3176_s6 + $0x18] sm:$0xff] }
 0x84d   :  { %2515 = vmatprep.mubr.msk.f32.mxu0 %vm2783_vm1, %v2782_v14  ;;  %v2589_v32 = vpack.c.bf16 %v2121_v31, %v2120_v29  ;;  %v2123_v34 = vld [vmem:[%s3176_s6 + $0x28] sm:$0xff] }
 0x84e   :  { %v1730_v35 = vsel %vm317_vm2, %v1728_v33, -inf }
 0x84f   :  { %1731 = vmax.xlane.f32.xlu0 %v1730_v35 }
 0x8dc   :  { %v1732_v36 = vpop.xlane.xlu0 %1731 }
 0x8dd   :  { %v1736_v37 = vsub.f32 %v1728_v33, %v1732_v36  ;;  %v2122_v33 = vld [vmem:[%s3176_s6 + $0x20] sm:$0xff] }
 0x8de   :  { %v2593_v35 = vpack.c.bf16 %v2123_v34, %v2122_v33 }
 0x8df   :  { %v1738_v40 = vmul.f32 1.442695, %v1736_v37 }
 0x8e1   :  { %2643 = vpow2.f32 %v1738_v40 }
 0x8eb   :  { %v2644_v41 = vpop.eup %2643 }
 0x8ec   :  { %v1742_v42 = vsel %vm317_vm2, %v2644_v41, 0.0 }
 0x8ed   :  { %1743 = vadd.xlane.f32.xlu0 %v1742_v42 }
 0x91f   :  { %v1724_v43 = vpop.f32.mrb[12].mxu0 }
 0x920   :  { %v1729_v44 = vmul.f32 0.35355338, %v1724_v43  ;;  %v2507_v45 = vpop.f32.mrb[13].mxu0 }
 0x922   :  { %v1733_v46 = vsel %vm317_vm2, %v1729_v44, -inf }
 0x923   :  { %1734 = vmax.xlane.f32.xlu1 %v1733_v46 }
 0x934   :  { %1834 = vrot.lane.b32.xlu1 %v2973_v38, %s2786_s21 }
 0x97a   :  { %v1744_v14 = vpop.xlane.xlu0 %1743 }
 0x97b   :  { %2645 = vrcp.f32 %v1744_v14 }
 0x985   :  { %v2646_v47 = vpop.eup %2645 }
 0x986   :  { %v1750_v48 = vmul.f32 %v2646_v47, %v1744_v14 }
 0x988   :  { %v1752_v49 = vsub.f32 2.0, %v1750_v48  ;;  %v2125_v48 = vld [vmem:[%s3176_s6 + $0x38] sm:$0xff] }
 0x98a   :  { %v1754_v50 = vmul.f32 %v2646_v47, %v1752_v49  ;;  %v2124_v47 = vld [vmem:[%s3176_s6 + $0x30] sm:$0xff]  ;;  %s2787_s6 = smov [#allocation9]  }
 0x98b   :  { %v2597_v49 = vpack.c.bf16 %v2125_v48, %v2124_v47  ;;  %s2253_s13 = sshll.u32 %s2787_s6, 4  ;;  %s2254_s13 = int_to_ptr.vmem [resolvable:$true] %s2253_s13 }
 0x98c   :  { %v1756_v51 = vmul.f32 %v2644_v41, %v1754_v50  ;;  %s2725_s14 = scalar_lea.vmem %s2254_s13, 1024  ;;  %p2730_p11 = scmp.lt.s32.totalorder %s2254_s13, %s2254_s13 }
 0x98d   :  { %p2726_p10 = scmp.ne.s32.totalorder %s2254_s13, %s2725_s14  ;;  %p2731_p12 = scmp.lt.s32.totalorder %s2725_s14, %s2725_s14 }
 0x98e   :  { %1997 = vst.msk [vmem:[#allocation9 + $0x18] sm:$0xff] %vm317_vm2, %v1756_v51 }
 0x98f   :  { %p2732_p13 = por %p2731_p12, %p2730_p11 }
 0x991   :  { %p2733_p0 = pnand %p2732_p13, %p2726_p10 }
 0x9b0   :  { %v1735_v52 = vpop.xlane.xlu1 %1734 }
 0x9b1   :  { %v1737_v53 = vsub.f32 %v1729_v44, %v1735_v52 }
 0x9b3   :  { %v1740_v54 = vmul.f32 1.442695, %v1737_v53 }
 0x9b4   :  { %v1835_v55 = vpop.permute.xlu1 %1834 }
 0x9b5   :  { %2647 = vpow2.f32 %v1740_v54  ;;  %2514 = vmatpush3.msra.mxu0 %v1835_v55 }
 0x9b6   :  { %2518 = vmatprep.subr.mxu0 %v1910_v1 }
 0x9bf   :  { %v2648_v56 = vpop.eup %2647 }
 0x9c0   :  { %v1745_v57 = vsel %vm317_vm2, %v2648_v56, 0.0 }
 0x9c1   :  { %1746 = vadd.xlane.f32.xlu0 %v1745_v57 }
 0x9d7   :  { %1758 = vrot.lane.b32.xlu0 %v2977_v39, %s2786_s21 }
 0xa4e   :  { %v1747_v38 = vpop.xlane.xlu0 %1746 }
 0xa4f   :  { %2649 = vrcp.f32 %v1747_v38 }
 0xa52   :  { %v1759_v58 = vpop.permute.xlu0 %1758 }
 0xa53   :  { %2509 = vmatpush3.msra.mxu1 %v1759_v58 }
 0xa54   :  { %2511 = vmatmul.mubr.msk.f32.vlgmr.msra.gmra.mrb[22].mxu1 %vm317_vm2, %v1756_v51 }
 0xa59   :  { %v2650_v59 = vpop.eup %2649 }
 0xa5a   :  { %v1751_v60 = vmul.f32 %v2650_v59, %v1747_v38 }
 0xa5c   :  { %v1753_v61 = vsub.f32 2.0, %v1751_v60 }
 0xa5e   :  { %v1755_v63 = vmul.f32 %v2650_v59, %v1753_v61 }
 0xa60   :  { %v1757_v0 = vmul.f32 %v2648_v56, %v1755_v63 }
 0xa62   :  { %2001 = vst.msk [vmem:[#allocation9 + $0x38] sm:$0xff] %vm317_vm2, %v1757_v0  ;;  %2516 = vmatmul.mubr.msk.f32.vlgmr.msra.gmra.mrb[14].mxu0 %vm317_vm2, %v1757_v0 }
 0xa63   :  { %2519 = vmatpush3.msra.mxu0 %v1910_v1 }
 0xa64   :  { %2586 = vmatprep.subr.bf16.mxu0 %v2585_v30 }
 0xb27   :  { %v1830_v2 = vpop.f32.mrb[22].mxu1 }
 0xb28   :  { %v2512_v39 = vpop.f32.mrb[23].mxu1  ;;  %2520 = vmatprep.mubr.msk.f32.mxu0 %vm317_vm2, %v1830_v2 }
 0xb35   :  { %v1906_v3 = vpop.f32.mrb[14].mxu0 }
 0xb36   :  { %v2517_v4 = vpop.f32.mrb[15].mxu0  ;;  %2521 = vmatmul.mubr.msk.f32.vlgmr.msra.gmra.mrb[8].mxu0 %vm317_vm2, %v1906_v3 }
 0xb37   :  { %2588 = vmatpush3.bf16.msra.mxu0 %v2585_v30 }
 0xb38   :  { %2590 = vmatprep.subr.bf16.mxu0 %v2589_v32 }
 0xb3b   :  { %2592 = vmatpush3.bf16.msra.mxu0 %v2589_v32 }
 0xb3c   :  { %2594 = vmatprep.subr.bf16.mxu0 %v2593_v35 }
 0xb3f   :  { %2596 = vmatpush3.bf16.msra.mxu0 %v2593_v35 }
 0xb40   :  { %2598 = vmatprep.subr.bf16.mxu0 %v2597_v49 }
 0xb43   :  { %2600 = vmatpush3.bf16.msra.mxu0 %v2597_v49 }
 0xc09   :  { %v2522_v6 = vpop.f32.mrb[8].mxu0 }
 0xc0a   :  { %v2003_v7 = vadd.f32 %v2522_v6, %v2916_v12  ;;  %v1983_v16 = vpop.f32.mrb[9].mxu0 }
 0xc0b   :  { %v2002_v15 = vadd.f32 %v1983_v16, %v2898_v5  ;;  %v2031_v5 = vld [vmem:[#allocation7] sm:$0xff] }
 0xc0c   :  { %v2007_v17 = vsel %vm77_vm0, %v2003_v7, 0.0  ;;  %v2577_v24 = vpack.c.bf16 %v2032_v22, %v2031_v5 }
 0xc0d   :  { %2008 = vadd.xlane.f32.xlu1 %v2007_v17  ;;  %v2004_v18 = vsel %vm77_vm0, %v2002_v15, 0.0 }
 0xc0e   :  { %2005 = vadd.xlane.f32.xlu0 %v2004_v18  ;;  %2578 = vmatprep.subr.bf16.mxu1 %v2577_v24 }
 0xc0f   :  { %2580 = vmatpush3.bf16.msra.mxu1 %v2577_v24 }
 0xc10   :  { %2582 = vmatprep.subr.bf16.mxu1 %v2581_v26 }
 0xc13   :  { %2584 = vmatpush3.bf16.msra.mxu1 %v2581_v26 }
 0xc9a   :  { %v2009_v9 = vpop.xlane.xlu1 %2008 }
 0xc9b   :  { %v2012_v8 = vmul.f32 0.03125, %v2009_v9  ;;  %v2006_v10 = vpop.xlane.xlu0 %2005 }
 0xc9c   :  { %v2011_v11 = vmul.f32 0.03125, %v2006_v10 }
 0xc9d   :  { %v2014_v13 = vsub.f32 %v2003_v7, %v2012_v8 }
 0xc9e   :  { %v2013_v62 = vsub.f32 %v2002_v15, %v2011_v11 }
 0xc9f   :  { %v2016_v21 = vmul.f32 %v2014_v13, %v2014_v13 }
 0xca0   :  { %v2015_v19 = vmul.f32 %v2013_v62, %v2013_v62 }
 0xca1   :  { %v2020_v12 = vsel %vm77_vm0, %v2016_v21, 0.0 }
 0xca2   :  { %v2017_v20 = vsel %vm77_vm0, %v2015_v19, 0.0 }
 0xca3   :  { %2018 = vadd.xlane.f32.xlu0 %v2017_v20 }
 0xca7   :  { %2021 = vadd.xlane.f32.xlu0 %v2020_v12 }
 0xd30   :  { %v2019_v36 = vpop.xlane.xlu0 %2018 }
 0xd31   :  { %v2023_v37 = vmul.f32 0.03125, %v2019_v36 }
 0xd33   :  { %v2025_v40 = vadd.f32 1e-05, %v2023_v37 }
 0xd34   :  { %v2022_v41 = vpop.xlane.xlu0 %2021 }
 0xd35   :  { %2651 = vrsqrt.f32 %v2025_v40  ;;  %v2024_v42 = vmul.f32 0.03125, %v2022_v41 }
 0xd37   :  { %v2026_v43 = vadd.f32 1e-05, %v2024_v42 }
 0xd39   :  { %2653 = vrsqrt.f32 %v2026_v43 }
 0xd3f   :  { %v2652_v44 = vpop.eup %2651 }
 0xd40   :  { %v2029_v45 = vmul.f32 %v2652_v44, %v2013_v62 }
 0xd42   :  { %2531 = vmatprep.mubr.msk.f32.mxu1 %vm77_vm0, %v2029_v45 }
 0xd43   :  { %v2654_v46 = vpop.eup %2653 }
 0xd44   :  { %v2030_v14 = vmul.f32 %v2654_v46, %v2014_v13 }
 0xd46   :  { %2532 = vmatmul.mubr.msk.f32.vlgmr.msra.gmra.mrb[24].mxu1 %vm77_vm0, %v2030_v14 }
 0xe19   :  { %v2533_v50 = vpop.f32.mrb[24].mxu1 }
 0xe1a   :  { %v2107_v51 = vpop.f32.mrb[25].mxu1  ;;  %v2117_v53 = vmax.f32 %v2533_v50, 0.0 }
 0xe1b   :  { %v2116_v52 = vmax.f32 %v2107_v51, 0.0 }
 0xe1d   :  { %2550 = vmatprep.mubr.msk.f32.mxu0 %vm2126_vm3, %v2116_v52 }
 0xe1e   :  { %2551 = vmatmul.mubr.msk.f32.vlgmr.msra.gmra.mrb[16].mxu0 %vm2126_vm3, %v2117_v53 }
 0xef1   :  { %v2552_v54 = vpop.f32.mrb[16].mxu0 }
 0xef2   :  { %v2205_v55 = vadd.f32 %v2552_v54, %v2030_v14  ;;  %v2199_v56 = vpop.f32.mrb[17].mxu0 }
 0xef3   :  { %v2200_v57 = vadd.f32 %v2199_v56, %v2029_v45 }
 0xef4   :  { %v2211_v38 = vsel %vm77_vm0, %v2205_v55, 0.0 }
 0xef5   :  { %2212 = vadd.xlane.f32.xlu1 %v2211_v38  ;;  %v2208_v58 = vsel %vm77_vm0, %v2200_v57, 0.0 }
 0xef6   :  { %2209 = vadd.xlane.f32.xlu0 %v2208_v58 }
 0xf82   :  { %v2213_v59 = vpop.xlane.xlu1 %2212 }
 0xf83   :  { %v2215_v60 = vmul.f32 0.03125, %v2213_v59  ;;  %v2210_v61 = vpop.xlane.xlu0 %2209 }
 0xf84   :  { %v2214_v63 = vmul.f32 0.03125, %v2210_v61 }
 0xf85   :  { %v2217_v0 = vsub.f32 %v2205_v55, %v2215_v60 }
 0xf86   :  { %v2216_v1 = vsub.f32 %v2200_v57, %v2214_v63 }
 0xf87   :  { %v2219_v2 = vmul.f32 %v2217_v0, %v2217_v0 }
 0xf88   :  { %v2218_v39 = vmul.f32 %v2216_v1, %v2216_v1 }
 0xf89   :  { %v2223_v3 = vsel %vm77_vm0, %v2219_v2, 0.0 }
 0xf8a   :  { %2224 = vadd.xlane.f32.xlu1 %v2223_v3  ;;  %v2220_v4 = vsel %vm77_vm0, %v2218_v39, 0.0 }
 0xf8b   :  { %2221 = vadd.xlane.f32.xlu0 %v2220_v4 }
 0xf8c   :  { %2736 = shalt.err (!%p2733_p0)
}
 0xf8d   :  { %s2737_s19 = scalar_lea.hbm %s3178_s8, 1024 }
 0xf8e   :  { %p2738_p1 = scmp.ne.s32.totalorder %s3178_s8, %s2737_s19  ;;  %p2741_p2 = scmp.lt.u32.totalorder %s2737_s19, %s3178_s8 }
 0xf90   :  { %p2743_p3 = pnand %p2741_p2, %p2738_p1 }
 0xf92   :  { %2746 = shalt.err (!%p2743_p3)
}
 0xf93   :  { %2259 = dma.vmem_to_hbm [thread:$0]  %s2254_s13, 1024, %s3178_s8, [#allocation10], %s2779_s17, %s2779_s17, %s2780_s18  }
 0xf94   :  { %s2788_s23 = smov [#allocation8]  }
 0xf95   :  { %s2241_s24 = sshll.u32 %s2788_s23, 4  ;;  %s2242_s24 = int_to_ptr.vmem [resolvable:$true] %s2241_s24 }
 0xf96   :  { %s2747_s8 = scalar_lea.vmem %s2242_s24, 256  ;;  %p2752_p5 = scmp.lt.s32.totalorder %s2242_s24, %s2242_s24 }
 0xf97   :  { %p2748_p4 = scmp.ne.s32.totalorder %s2242_s24, %s2747_s8  ;;  %p2753_p6 = scmp.lt.s32.totalorder %s2747_s8, %s2747_s8 }
 0xf99   :  { %p2754_p7 = por %p2753_p6, %p2752_p5 }
 0xf9b   :  { %p2755_p8 = pnand %p2754_p7, %p2748_p4 }
0x1017   :  { %v2225_v6 = vpop.xlane.xlu1 %2224 }
0x1018   :  { %v2227_v7 = vmul.f32 0.03125, %v2225_v6  ;;  %v2222_v16 = vpop.xlane.xlu0 %2221 }
0x1019   :  { %v2226_v15 = vmul.f32 0.03125, %v2222_v16 }
0x101a   :  { %v2229_v17 = vadd.f32 1e-05, %v2227_v7 }
0x101b   :  { %v2228_v18 = vadd.f32 1e-05, %v2226_v15 }
0x101c   :  { %2655 = vrsqrt.f32 %v2229_v17 }
0x101d   :  { %2657 = vrsqrt.f32 %v2228_v18 }
0x1026   :  { %v2656_v9 = vpop.eup %2655 }
0x1027   :  { %v2658_v8 = vpop.eup %2657  ;;  %v2233_v10 = vmul.f32 %v2656_v9, %v2217_v0 }
0x1028   :  { %v2232_v11 = vmul.f32 %v2658_v8, %v2216_v1 }
0x1029   :  { %2235 = vst.msk [vmem:[#allocation8 + $0x8] sm:$0xff] %vm77_vm0, %v2233_v10 }
0x102a   :  { %2234 = vst.msk [vmem:[#allocation8] sm:$0xff] %vm77_vm0, %v2232_v11 }
0x102b   :  { %2758 = shalt.err (!%p2755_p8)
}
0x102c   :  { %s2759_s27 = scalar_lea.hbm %s3177_s7, 256 }
0x102d   :  { %p2760_p9 = scmp.ne.s32.totalorder %s3177_s7, %s2759_s27  ;;  %p2763_p10 = scmp.lt.u32.totalorder %s2759_s27, %s3177_s7 }
0x102f   :  { %p2765_p11 = pnand %p2763_p10, %p2760_p9 }
0x1031   :  { %2768 = shalt.err (!%p2765_p11)
}
0x1032   :  { %2247 = dma.vmem_to_hbm [thread:$0]  %s2242_s24, 256, %s3177_s7, [#allocation4], %s2779_s17, %s2779_s17, %s2780_s18  }
0x1033   :  { %2773 = dma.done.wait [#allocation4], 256  }
0x1034   :  { %2774 = vsyncadd [#allocation4], 4294967040 }
0x1035   :  { %2775 = dma.done.wait [#allocation10], 1024  }
0x1036   :  { %2776 = vsyncadd [#allocation10], 4294966272 }
0x1037   :  { %2266 = vsyncpa [#allocation3], 1 }
0x1038   :  { %2267 = vsyncpa [#allocation6], 1 }
0x1039   :  { %2268 = vsyncpa [#allocation4], 1 }
0x103a   :  { %2269 = vsyncpa [#allocation10], 1 }

</bundles_post_ra>
